<compile_context>
chip_gen: v7x
topology: tpu7x:2x2x1
jax: 0.10.0
libtpu: 0.0.40
codegen_flags: <defaults>
</compile_context>

<pallas_src>
import functools
import math

import jax
import jax.numpy as jnp
from jax.experimental import pallas as pl
from jax.experimental.pallas import tpu as pltpu

_LANE = 128  # TPU lane width: last-dim tiling granularity


def _round_up(n, m):
    return ((n + m - 1) // m) * m


def _fused_mlp_kernel(*refs, num_layers):
    """One row-tile of the whole MLP: relu(x@W1+b1) ... @ Wn + bn.

    refs = (x_ref, w1, b1, ..., wn, bn, o_ref).  Intermediates live in
    vregs / compiler-managed VMEM; nothing round-trips HBM between layers.
    """
    x_ref = refs[0]
    o_ref = refs[-1]
    h = x_ref[...]                                       # (tm, K0) bf16
    for i in range(num_layers):
        w = refs[1 + 2 * i][...]                         # (Kp, Np) bf16
        b = refs[2 + 2 * i][...]                         # (1, Np)  f32
        y = jnp.dot(h, w, preferred_element_type=jnp.float32) + b
        if i < num_layers - 1:
            h = jnp.maximum(y, 0.0).astype(jnp.bfloat16)  # back to bf16 for MXU
        else:
            h = y                                        # final layer stays f32
    o_ref[...] = h.astype(o_ref.dtype)


def init_mlp_params(key, input_dim, hidden_dim, output_dim, num_layers):
    """nn.Linear-style init; W stored transposed as (in, out), b as (out,)."""
    h = [hidden_dim] * (num_layers - 1)
    params = []
    for n_in, n_out in zip([input_dim] + h, h + [output_dim]):
        key, kw, kb = jax.random.split(key, 3)
        bound = 1.0 / math.sqrt(n_in)
        w = jax.random.uniform(kw, (n_in, n_out), jnp.float32, -bound, bound)
        b = jax.random.uniform(kb, (n_out,), jnp.float32, -bound, bound)
        params.append((w, b))
    return params


def prepare_mlp_params(params):
    """One-time prep.

    * Out-dims are zero-padded to a multiple of 128 (lane-dense loads/stores).
    * Layer 0 keeps its TRUE in-dim (so x needs no K padding; any K is legal
      because the block's last dim equals the full array dim).  Deeper layers
      consume the previous layer's 128-padded output, so their in-dim is
      padded to 128 to match.
    * Weights cast to bf16 for the MXU; biases stay f32 for the epilogue.
    Zero-padding keeps the math exact (padded rows/cols stay identically 0).
    """
    prepared = []
    for idx, (w, b) in enumerate(params):
        K, N = w.shape
        Kp = K if idx == 0 else _round_up(K, _LANE)
        Np = _round_up(N, _LANE)
        w_pad = jnp.zeros((Kp, Np), jnp.bfloat16).at[:K, :N].set(
            w.astype(jnp.bfloat16))
        b_pad = jnp.zeros((1, Np), jnp.float32).at[0, :N].set(
            b.astype(jnp.float32))
        prepared.append((w_pad, b_pad))
    return prepared


def _resident_spec(shape):
    """BlockSpec for a grid-invariant block (same block index every grid step
    -> fetched once, stays resident in VMEM).  Request single buffering when
    pl.Buffered is available: halves resident weight VMEM (matters for
    production FFN sizes on v7x's 64 MiB VMEM / 32 MiB scoped default)."""
    index_map = lambda i: (0,) * len(shape)
    if hasattr(pl, "Buffered"):
        try:
            return pl.BlockSpec(shape, index_map, pipeline_mode=pl.Buffered(1))
        except Exception:  # older BlockSpec signature: fall back to default
            pass
    return pl.BlockSpec(shape, index_map)


def _pick_row_tile(M, tm):
    """Row-tile size.  Big tiles amortize the ~0.35us/step grid overhead;
    for small M aim for exactly 2 row tiles so the "parallel" axis can span
    both v7x TensorCores, never going below 16 rows (bf16 (16,128) tile)."""
    if M > tm:
        return tm
    half = _round_up((M + 1) // 2, 16)
    return min(max(16, half), max(16, _round_up(M, 16)))


@functools.partial(jax.jit, static_argnames=("output_dim", "tm"))
def mlp_forward(x, padded_params, *, output_dim, tm=1024):
    """Forward identical to MLP.forward (ReLU on all but the last layer).

    x: (..., input_dim) f32.  padded_params: output of prepare_mlp_params.
    """
    lead = x.shape[:-1]
    K = x.shape[-1]
    M = int(math.prod(lead))
    num_layers = len(padded_params)

    K0 = padded_params[0][0].shape[0]
    Np_out = padded_params[-1][0].shape[1]
    assert K0 == K, (K0, K)
    assert output_dim <= Np_out

    tm_eff = _pick_row_tile(M, tm)
    grid_m = pl.cdiv(M, tm_eff)

    # No K padding and no row padding: reshape is free, bf16 cast halves the
    # x HBM read.  The trailing partial row tile is handled by Pallas
    # edge-block DMA; rows past M are garbage sliced off below.
    x2 = x.reshape(M, K).astype(jnp.bfloat16)

    in_specs = [pl.BlockSpec((tm_eff, K), lambda i: (i, 0))]
    flat = [x2]
    for w_pad, b_pad in padded_params:
        # TODO(synk): for production-size FFNs (K,N ~ 1k-4k) add an N-tile grid
        # axis so weights stream as (Kp, tn) blocks (Buffered(2-3)) instead of
        # being fully resident, use 256-wide N tiles for v6e/v7x's 256-wide
        # MXUs, and set vmem_limit_bytes explicitly (v5e scoped default is
        # only 16 MiB; v7x physical VMEM is 64 MiB).
        in_specs.append(_resident_spec(w_pad.shape))
        in_specs.append(_resident_spec(b_pad.shape))
        flat += [w_pad, b_pad]

    # Advisory cost estimate: helps XLA schedule the surrounding cast/slice
    # ops around the custom call.
    flops = 2 * M * sum(int(w.shape[0]) * int(w.shape[1])
                        for w, _ in padded_params)
    bytes_accessed = (M * K * 2
                      + sum(int(w.size) * 2 + int(b.size) * 4
                            for w, b in padded_params)
                      + M * Np_out * 4)
    cost = pl.CostEstimate(flops=flops, transcendentals=0,
                           bytes_accessed=bytes_accessed)

    out = pl.pallas_call(
        functools.partial(_fused_mlp_kernel, num_layers=num_layers),
        out_shape=jax.ShapeDtypeStruct((M, Np_out), jnp.float32),
        grid=(grid_m,),
        in_specs=in_specs,
        out_specs=pl.BlockSpec((tm_eff, Np_out), lambda i: (i, 0)),
        compiler_params=pltpu.CompilerParams(
            dimension_semantics=("parallel",)),
        cost_estimate=cost,
    )(*flat)

    # TODO(synk): downstream consumers that tolerate the padded 128-wide slab
    # (or bf16) can fold this slice/reshape away entirely.
    return out[:, :output_dim].reshape(*lead, output_dim)


def mlp_reference(x, params, *, match_kernel_bf16=True):
    """Pure-JAX reference.  match_kernel_bf16=True mirrors the kernel's bf16
    MXU inputs / f32 accumulation; False is the full-f32 PyTorch-style path."""
    n = len(params)
    h = x.astype(jnp.float32)
    for i, (w, b) in enumerate(params):
        if match_kernel_bf16:
            y = jnp.dot(h.astype(jnp.bfloat16), w.astype(jnp.bfloat16),
                        preferred_element_type=jnp.float32)
        else:
            y = jnp.dot(h, w, preferred_element_type=jnp.float32)
        y = y + b
        h = jax.nn.relu(y) if i < n - 1 else y
    return h


if __name__ == "__main__":
    # Shapes consistent with RF-DETR's bbox-head usage of MLP.
    input_dim, hidden_dim, output_dim, num_layers = 32, 32, 4, 3

    key = jax.random.PRNGKey(0)
    key, kx = jax.random.split(key)
    x = jax.random.normal(kx, (2, 8, input_dim), dtype=jnp.float32)

    params = init_mlp_params(key, input_dim, hidden_dim, output_dim, num_layers)
    padded_params = prepare_mlp_params(params)

    out = jax.block_until_ready(
        mlp_forward(x, padded_params, output_dim=output_dim))
    assert out.shape == (2, 8, output_dim), out.shape
    ref_bf16 = mlp_reference(x, params, match_kernel_bf16=True)
    ref_f32 = mlp_reference(x, params, match_kernel_bf16=False)
    assert jnp.allclose(out, ref_bf16, atol=1e-4, rtol=1e-4), \
        "mismatch vs bf16-matched reference"
    assert jnp.allclose(out, ref_f32, atol=5e-2, rtol=5e-2), \
        "mismatch vs f32 reference"

    # Second check: RF-DETR-like row count (batch*queries = 2*300 = 600).
    # With tm=1024 this yields a 2-step "parallel" grid (304 + 296-row edge
    # block): exercises both the v7x two-TensorCore split and the
    # partial-edge-block (unpadded rows) path.
    x_big = jax.random.normal(jax.random.PRNGKey(1), (2, 300, input_dim),
                              dtype=jnp.float32)
    out_big = jax.block_until_ready(
        mlp_forward(x_big, padded_params, output_dim=output_dim))
    ref_big = mlp_reference(x_big, params, match_kernel_bf16=True)
    assert out_big.shape == (2, 300, output_dim), out_big.shape
    assert jnp.allclose(out_big, ref_big, atol=1e-4, rtol=1e-4), \
        "mismatch vs reference (partial edge-block case)"

    print("KERNEL_OK")
</pallas_src>

<mosaic_0001>
module attributes {stable_mosaic.version = 11 : i64} {
  func.func @_fused_mlp_kernel(%arg0: i32, %arg1: memref<16x32xbf16, #tpu.memory_space<vmem>>, %arg2: memref<32x128xbf16, #tpu.memory_space<vmem>>, %arg3: memref<1x128xf32, #tpu.memory_space<vmem>>, %arg4: memref<128x128xbf16, #tpu.memory_space<vmem>>, %arg5: memref<1x128xf32, #tpu.memory_space<vmem>>, %arg6: memref<128x128xbf16, #tpu.memory_space<vmem>>, %arg7: memref<1x128xf32, #tpu.memory_space<vmem>>, %arg8: memref<16x128xf32, #tpu.memory_space<vmem>>) attributes {dimension_semantics = [#tpu.dimension_semantics<parallel>], iteration_bounds = array<i64: 1>, scalar_prefetch = 0 : i64, scratch_operands = 0 : i64, tpu.core_type = #tpu.core_type<tc>, window_params = [{transform_indices = @transform_0, window_bounds = array<i64: 16, 32>}, {pipeline_mode = #tpu.pipeline_mode<synchronous>, transform_indices = @transform_1, window_bounds = array<i64: 32, 128>}, {pipeline_mode = #tpu.pipeline_mode<synchronous>, transform_indices = @transform_2, window_bounds = array<i64: 1, 128>}, {pipeline_mode = #tpu.pipeline_mode<synchronous>, transform_indices = @transform_3, window_bounds = array<i64: 128, 128>}, {pipeline_mode = #tpu.pipeline_mode<synchronous>, transform_indices = @transform_4, window_bounds = array<i64: 1, 128>}, {pipeline_mode = #tpu.pipeline_mode<synchronous>, transform_indices = @transform_5, window_bounds = array<i64: 128, 128>}, {pipeline_mode = #tpu.pipeline_mode<synchronous>, transform_indices = @transform_6, window_bounds = array<i64: 1, 128>}, {transform_indices = @transform_7, window_bounds = array<i64: 16, 128>}]} {
    %c0 = arith.constant 0 : index
    %c0_0 = arith.constant 0 : index
    %0 = vector.load %arg1[%c0, %c0_0] : memref<16x32xbf16, #tpu.memory_space<vmem>>, vector<16x32xbf16>
    %c0_1 = arith.constant 0 : index
    %c0_2 = arith.constant 0 : index
    %1 = vector.load %arg2[%c0_1, %c0_2] : memref<32x128xbf16, #tpu.memory_space<vmem>>, vector<32x128xbf16>
    %c0_3 = arith.constant 0 : index
    %c0_4 = arith.constant 0 : index
    %2 = vector.load %arg3[%c0_3, %c0_4] : memref<1x128xf32, #tpu.memory_space<vmem>>, vector<1x128xf32>
    %cst = arith.constant dense<0.000000e+00> : vector<16x128xf32>
    %3 = tpu.matmul %0, %1, %cst {dimension_numbers = #tpu.dot_dimension_numbers<[1], [0], [0], [1], [0, 0, 1, 1], [], []>} : vector<16x32xbf16>, vector<32x128xbf16>, vector<16x128xf32> -> vector<16x128xf32>
    %4 = vector.broadcast %2 : vector<1x128xf32> to vector<16x128xf32>
    %5 = arith.addf %3, %4 : vector<16x128xf32>
    %cst_5 = arith.constant 0.000000e+00 : f32
    %6 = vector.broadcast %cst_5 : f32 to vector<16x128xf32>
    %7 = arith.maximumf %5, %6 : vector<16x128xf32>
    %8 = arith.truncf %7 : vector<16x128xf32> to vector<16x128xbf16>
    %c0_6 = arith.constant 0 : index
    %c0_7 = arith.constant 0 : index
    %9 = vector.load %arg4[%c0_6, %c0_7] : memref<128x128xbf16, #tpu.memory_space<vmem>>, vector<128x128xbf16>
    %c0_8 = arith.constant 0 : index
    %c0_9 = arith.constant 0 : index
    %10 = vector.load %arg5[%c0_8, %c0_9] : memref<1x128xf32, #tpu.memory_space<vmem>>, vector<1x128xf32>
    %cst_10 = arith.constant dense<0.000000e+00> : vector<16x128xf32>
    %11 = tpu.matmul %8, %9, %cst_10 {dimension_numbers = #tpu.dot_dimension_numbers<[1], [0], [0], [1], [0, 0, 1, 1], [], []>} : vector<16x128xbf16>, vector<128x128xbf16>, vector<16x128xf32> -> vector<16x128xf32>
    %12 = vector.broadcast %10 : vector<1x128xf32> to vector<16x128xf32>
    %13 = arith.addf %11, %12 : vector<16x128xf32>
    %cst_11 = arith.constant 0.000000e+00 : f32
    %14 = vector.broadcast %cst_11 : f32 to vector<16x128xf32>
    %15 = arith.maximumf %13, %14 : vector<16x128xf32>
    %16 = arith.truncf %15 : vector<16x128xf32> to vector<16x128xbf16>
    %c0_12 = arith.constant 0 : index
    %c0_13 = arith.constant 0 : index
    %17 = vector.load %arg6[%c0_12, %c0_13] : memref<128x128xbf16, #tpu.memory_space<vmem>>, vector<128x128xbf16>
    %c0_14 = arith.constant 0 : index
    %c0_15 = arith.constant 0 : index
    %18 = vector.load %arg7[%c0_14, %c0_15] : memref<1x128xf32, #tpu.memory_space<vmem>>, vector<1x128xf32>
    %cst_16 = arith.constant dense<0.000000e+00> : vector<16x128xf32>
    %19 = tpu.matmul %16, %17, %cst_16 {dimension_numbers = #tpu.dot_dimension_numbers<[1], [0], [0], [1], [0, 0, 1, 1], [], []>} : vector<16x128xbf16>, vector<128x128xbf16>, vector<16x128xf32> -> vector<16x128xf32>
    %20 = vector.broadcast %18 : vector<1x128xf32> to vector<16x128xf32>
    %21 = arith.addf %19, %20 : vector<16x128xf32>
    %c0_17 = arith.constant 0 : index
    %c0_18 = arith.constant 0 : index
    %22 = vector.load %arg8[%c0_17, %c0_18] : memref<16x128xf32, #tpu.memory_space<vmem>>, vector<16x128xf32>
    tpu.vector_store %arg8[%c0_17, %c0_18], %21 {strides = array<i32>} : memref<16x128xf32, #tpu.memory_space<vmem>>, vector<16x128xf32>,
    return
  }
  func.func @transform_0(%arg0: i32) -> (i32, i32) {
    %c0_i32 = arith.constant 0 : i32
    %c0_i32_0 = arith.constant 0 : i32
    return %arg0, %c0_i32 : i32, i32
  }
  func.func @transform_1(%arg0: i32) -> (i32, i32) {
    %c0_i32 = arith.constant 0 : i32
    %c0_i32_0 = arith.constant 0 : i32
    %c0_i32_1 = arith.constant 0 : i32
    return %c0_i32, %c0_i32_0 : i32, i32
  }
  func.func @transform_2(%arg0: i32) -> (i32, i32) {
    %c0_i32 = arith.constant 0 : i32
    %c0_i32_0 = arith.constant 0 : i32
    %c0_i32_1 = arith.constant 0 : i32
    return %c0_i32, %c0_i32_0 : i32, i32
  }
  func.func @transform_3(%arg0: i32) -> (i32, i32) {
    %c0_i32 = arith.constant 0 : i32
    %c0_i32_0 = arith.constant 0 : i32
    %c0_i32_1 = arith.constant 0 : i32
    return %c0_i32, %c0_i32_0 : i32, i32
  }
  func.func @transform_4(%arg0: i32) -> (i32, i32) {
    %c0_i32 = arith.constant 0 : i32
    %c0_i32_0 = arith.constant 0 : i32
    %c0_i32_1 = arith.constant 0 : i32
    return %c0_i32, %c0_i32_0 : i32, i32
  }
  func.func @transform_5(%arg0: i32) -> (i32, i32) {
    %c0_i32 = arith.constant 0 : i32
    %c0_i32_0 = arith.constant 0 : i32
    %c0_i32_1 = arith.constant 0 : i32
    return %c0_i32, %c0_i32_0 : i32, i32
  }
  func.func @transform_6(%arg0: i32) -> (i32, i32) {
    %c0_i32 = arith.constant 0 : i32
    %c0_i32_0 = arith.constant 0 : i32
    %c0_i32_1 = arith.constant 0 : i32
    return %c0_i32, %c0_i32_0 : i32, i32
  }
  func.func @transform_7(%arg0: i32) -> (i32, i32) {
    %c0_i32 = arith.constant 0 : i32
    %c0_i32_0 = arith.constant 0 : i32
    return %arg0, %c0_i32 : i32, i32
  }
}

</mosaic_0001>

<bundles_post_ra>
// kernel: mlp_forward.1
= control target key start
LH: loop header
LB: loop body
LE: loop exit
PB: predicated region body
PF: predicated region fallthrough
CT: control target
= control target key end

     0   :  { %12 = vsyncpa [#allocation3], 0  ;;  %s651_s0 = inlined_call_operand.vmem [shape: bf16[16,32], index: 0, kind: input, shape index: {}]   ;;  %s652_s1 = inlined_call_operand.vmem [shape: bf16[32,128], index: 1, kind: input, shape index: {}]   ;;  %s653_s2 = inlined_call_operand.vmem [shape: f32[1,128], index: 2, kind: input, shape index: {}]   ;;  %s654_s3 = inlined_call_operand.hbm [shape: bf16[128,128], index: 3, kind: input, shape index: {}]   ;;  %s655_s4 = inlined_call_operand.vmem [shape: f32[1,128], index: 4, kind: input, shape index: {}]   ;;  %s656_s5 = inlined_call_operand.hbm [shape: bf16[128,128], index: 5, kind: input, shape index: {}]   ;;  %s657_s6 = inlined_call_operand.vmem [shape: f32[1,128], index: 6, kind: input, shape index: {}]   ;;  %s658_s7 = inlined_call_operand.vmem [shape: f32[16,128], index: 7, kind: output, shape index: {}]  }
   0x1   :  { %13 = vsyncpa [#allocation5], 0  ;;  %s533_s24 = smov [#allocation2]   ;;  %s485_s28 = scalar_lea.hbm %s654_s3, 1024 }
   0x2   :  { %s25_s25 = sshll.u32 %s533_s24, 4  ;;  %p486_p0 = scmp.ne.s32.totalorder %s654_s3, %s485_s28  ;;  %s26_s25 = int_to_ptr.vmem [resolvable:$true] %s25_s25 }
   0x3   :  { %p489_p1 = scmp.lt.u32.totalorder %s485_s28, %s654_s3 }
   0x5   :  { %p491_p2 = pnand %p489_p1, %p486_p0 }
   0x7   :  { %494 = shalt.err (!%p491_p2)
}
   0x8   :  { %s495_s10 = scalar_lea.vmem %s26_s25, 1024  ;;  %p500_p4 = scmp.lt.s32.totalorder %s26_s25, %s26_s25 }
   0x9   :  { %p496_p3 = scmp.ne.s32.totalorder %s26_s25, %s495_s10  ;;  %p501_p5 = scmp.lt.s32.totalorder %s495_s10, %s495_s10 }
   0xb   :  { %p502_p6 = por %p501_p5, %p500_p4 }
   0xd   :  { %p503_p7 = pnand %p502_p6, %p496_p3 }
   0xf   :  { %506 = shalt.err (!%p503_p7)
}
  0x10   :  { %s534_s11 = smov 64   ;;  %s535_s12 = smov 4  }
  0x11   :  { %31 = dma.hbm_to_vmem [thread:$0]  %s654_s3, 1024, %s26_s25, [#allocation3], %s534_s11, %s534_s11, %s535_s12  }
  0x12   :  { %s536_s15 = smov [#allocation4]   ;;  %s507_s19 = scalar_lea.hbm %s656_s5, 1024 }
  0x13   :  { %s39_s16 = sshll.u32 %s536_s15, 4  ;;  %p508_p8 = scmp.ne.s32.totalorder %s656_s5, %s507_s19  ;;  %s40_s16 = int_to_ptr.vmem [resolvable:$true] %s39_s16 }
  0x14   :  { %p511_p9 = scmp.lt.u32.totalorder %s507_s19, %s656_s5 }
  0x16   :  { %p513_p10 = pnand %p511_p9, %p508_p8 }
  0x18   :  { %516 = shalt.err (!%p513_p10)
}
  0x19   :  { %s517_s24 = scalar_lea.vmem %s40_s16, 1024  ;;  %p522_p12 = scmp.lt.s32.totalorder %s40_s16, %s40_s16 }
  0x1a   :  { %p518_p11 = scmp.ne.s32.totalorder %s40_s16, %s517_s24  ;;  %p523_p13 = scmp.lt.s32.totalorder %s517_s24, %s517_s24 }
  0x1c   :  { %p524_p0 = por %p523_p13, %p522_p12 }
  0x1e   :  { %p525_p1 = pnand %p524_p0, %p518_p11 }
  0x20   :  { %528 = shalt.err (!%p525_p1)
}
  0x21   :  { %45 = dma.hbm_to_vmem [thread:$0]  %s656_s5, 1024, %s40_s16, [#allocation5], %s534_s11, %s534_s11, %s535_s12  }
  0x22   :  { %529 = dma.done.wait [#allocation3], 1024  }
  0x23   :  { %530 = vsyncadd [#allocation3], 4294966272 }
  0x24   :  { %531 = dma.done.wait [#allocation5], 1024  }
  0x25   :  { %532 = vsyncadd [#allocation5], 4294966272  ;;  %v537_v0 = vmov 0.0   ;;  %vm538_vm0 = vmmov 0   ;;  %v466_v1 = vld [vmem:[%s652_s1] sm:$0xff]   ;;  %v467_v2 = vld [vmem:[%s652_s1 + $0x8] sm:$0xff]  }
  0x26   :  { %412 = vmatprep.subr.bf16.mxu0 %v537_v0  ;;  %416 = vmatprep.mubr.msk.bf16.mxu0 %vm538_vm0, %v537_v0  ;;  %v469_v3 = vld [vmem:[#allocation2] sm:$0xff]   ;;  %v470_v5 = vld [vmem:[#allocation2 + $0x8] sm:$0xff]   ;;  %vm85_vm1 = vcmask 261120   ;;  %v471_v6 = vld [vmem:[#allocation2 + $0x10] sm:$0xff]  }
  0x27   :  { %420 = vmatprep.subr.bf16.mxu1 %v537_v0  ;;  %436 = vmatprep.mubr.msk.bf16.mxu1 %vm538_vm0, %v537_v0  ;;  %v468_v4 = vld [vmem:[%s651_s0] sm:$0xff]   ;;  %v472_v7 = vld [vmem:[#allocation2 + $0x18] sm:$0xff]   ;;  %v474_v9 = vld [vmem:[#allocation2 + $0x28] sm:$0xff]  }
  0x28   :  { %413 = vmatpush3.bf16.msra.mxu0 %v466_v1  ;;  %421 = vmatpush3.bf16.msra.mxu1 %v469_v3  ;;  %v473_v8 = vld [vmem:[#allocation2 + $0x20] sm:$0xff]   ;;  %v475_v10 = vld [vmem:[#allocation2 + $0x30] sm:$0xff]   ;;  %v476_v11 = vld [vmem:[#allocation2 + $0x38] sm:$0xff]  }
  0x29   :  { %414 = vmatprep.subr.bf16.mxu0 %v537_v0  ;;  %422 = vmatprep.subr.bf16.mxu1 %v537_v0  ;;  %v477_v12 = vld [vmem:[#allocation4] sm:$0xff]   ;;  %v478_v13 = vld [vmem:[#allocation4 + $0x8] sm:$0xff]   ;;  %v479_v14 = vld [vmem:[#allocation4 + $0x10] sm:$0xff]  }
  0x2a   :  { %v480_v15 = vld [vmem:[#allocation4 + $0x18] sm:$0xff]   ;;  %v481_v16 = vld [vmem:[#allocation4 + $0x20] sm:$0xff]   ;;  %v482_v17 = vld [vmem:[#allocation4 + $0x28] sm:$0xff]  }
  0x2b   :  { %v368_v18 = vld [vmem:[%s653_s2] ss:$0 sm:$0xff]  ;;  %v483_v28 = vld [vmem:[#allocation4 + $0x30] sm:$0xff]   ;;  %v484_v29 = vld [vmem:[#allocation4 + $0x38] sm:$0xff]  }
  0x2c   :  { %415 = vmatpush3.bf16.msra.mxu0 %v467_v2  ;;  %423 = vmatpush3.bf16.msra.mxu1 %v470_v5  ;;  %v373_v30 = vld [vmem:[%s655_s4] ss:$0 sm:$0xff] }
  0x2d   :  { %440 = vmatprep.subr.bf16.mxu0 %v537_v0  ;;  %424 = vmatprep.subr.bf16.mxu1 %v537_v0  ;;  %v382_v40 = vld [vmem:[%s657_s6] ss:$0 sm:$0xff] }
  0x2f   :  { %417 = vmatmul.mubr.msk.bf16.vlgmr.msra.gmra.mrb[0].mxu0 %vm85_vm1, %v468_v4 }
  0x30   :  { %456 = vmatprep.mubr.msk.bf16.mxu0 %vm538_vm0, %v537_v0  ;;  %425 = vmatpush3.bf16.msra.mxu1 %v471_v6 }
  0x31   :  { %426 = vmatprep.subr.bf16.mxu1 %v537_v0  ;;  %441 = vmatpush3.bf16.msra.mxu0 %v477_v12 }
  0x32   :  { %442 = vmatprep.subr.bf16.mxu0 %v537_v0 }
  0x34   :  { %427 = vmatpush3.bf16.msra.mxu1 %v472_v7 }
  0x35   :  { %428 = vmatprep.subr.bf16.mxu1 %v537_v0  ;;  %443 = vmatpush3.bf16.msra.mxu0 %v478_v13 }
  0x36   :  { %444 = vmatprep.subr.bf16.mxu0 %v537_v0 }
  0x38   :  { %429 = vmatpush3.bf16.msra.mxu1 %v473_v8 }
  0x39   :  { %430 = vmatprep.subr.bf16.mxu1 %v537_v0  ;;  %445 = vmatpush3.bf16.msra.mxu0 %v479_v14 }
  0x3a   :  { %446 = vmatprep.subr.bf16.mxu0 %v537_v0 }
  0x3c   :  { %431 = vmatpush3.bf16.msra.mxu1 %v474_v9 }
  0x3d   :  { %432 = vmatprep.subr.bf16.mxu1 %v537_v0  ;;  %447 = vmatpush3.bf16.msra.mxu0 %v480_v15 }
  0x3e   :  { %448 = vmatprep.subr.bf16.mxu0 %v537_v0 }
  0x40   :  { %433 = vmatpush3.bf16.msra.mxu1 %v475_v10 }
  0x41   :  { %434 = vmatprep.subr.bf16.mxu1 %v537_v0  ;;  %449 = vmatpush3.bf16.msra.mxu0 %v481_v16 }
  0x42   :  { %450 = vmatprep.subr.bf16.mxu0 %v537_v0 }
  0x44   :  { %435 = vmatpush3.bf16.msra.mxu1 %v476_v11 }
  0x45   :  { %451 = vmatpush3.bf16.msra.mxu0 %v482_v17 }
  0x46   :  { %452 = vmatprep.subr.bf16.mxu0 %v537_v0 }
  0x49   :  { %453 = vmatpush3.bf16.msra.mxu0 %v483_v28 }
  0x4a   :  { %454 = vmatprep.subr.bf16.mxu0 %v537_v0 }
  0x4d   :  { %455 = vmatpush3.bf16.msra.mxu0 %v484_v29 }
 0x102   :  { %v123_v19 = vpop.f32.mrb[0].mxu0 }
 0x103   :  { %v124_v20 = vadd.f32 %v368_v18, %v123_v19  ;;  %v418_v21 = vpop.f32.mrb[1].mxu0 }
 0x104   :  { %v126_v22 = vpop.f32.mrb[2].mxu0 }
 0x105   :  { %v127_v23 = vadd.f32 %v368_v18, %v126_v22  ;;  %v419_v24 = vpop.f32.mrb[3].mxu0  ;;  %v130_v25 = vmax.f32 %v124_v20, 0.0 }
 0x107   :  { %v131_v26 = vmax.f32 %v127_v23, 0.0 }
 0x109   :  { %v132_v27 = vpack.c.bf16 %v131_v26, %v130_v25 }
 0x10b   :  { %437 = vmatmul.mubr.bf16.vlgmr.msra.gmra.mrb[0].mxu1 %v132_v27 }
 0x1de   :  { %v238_v31 = vpop.f32.mrb[0].mxu1 }
 0x1df   :  { %v239_v32 = vadd.f32 %v373_v30, %v238_v31  ;;  %v438_v33 = vpop.f32.mrb[1].mxu1 }
 0x1e0   :  { %v241_v34 = vpop.f32.mrb[2].mxu1 }
 0x1e1   :  { %v242_v35 = vadd.f32 %v373_v30, %v241_v34  ;;  %v439_v36 = vpop.f32.mrb[3].mxu1  ;;  %v245_v37 = vmax.f32 %v239_v32, 0.0 }
 0x1e3   :  { %v246_v38 = vmax.f32 %v242_v35, 0.0 }
 0x1e5   :  { %v247_v39 = vpack.c.bf16 %v246_v38, %v245_v37 }
 0x1e7   :  { %457 = vmatmul.mubr.bf16.vlgmr.msra.gmra.mrb[4].mxu0 %v247_v39 }
 0x2ba   :  { %v353_v41 = vpop.f32.mrb[4].mxu0 }
 0x2bb   :  { %v354_v42 = vadd.f32 %v382_v40, %v353_v41  ;;  %v458_v43 = vpop.f32.mrb[5].mxu0 }
 0x2bc   :  { %v356_v44 = vpop.f32.mrb[6].mxu0 }
 0x2bd   :  { %360 = vst [vmem:[%s658_s7] sm:$0xff] %v354_v42  ;;  %v357_v45 = vadd.f32 %v382_v40, %v356_v44  ;;  %v459_v46 = vpop.f32.mrb[7].mxu0 }
 0x2bf   :  { %361 = vst [vmem:[%s658_s7 + $0x8] sm:$0xff] %v357_v45 }
 0x2c0   :  { %366 = vsyncpa [#allocation3], 1 }
 0x2c1   :  { %367 = vsyncpa [#allocation5], 1 }

</bundles_post_ra>
